<compile_context>
chip_gen: v7x
topology: tpu7x:2x2x1
jax: 0.10.0
libtpu: 0.0.40
codegen_flags: <defaults>
</compile_context>

<pallas_src>
import numpy as np
import jax
import jax.numpy as jnp
from jax import lax
from jax.experimental import pallas as pl
from jax.experimental.pallas import tpu as pltpu


def _ru(x, m):
    return -(-int(x) // m) * m


def _make_kernel(Bb, L, Hpad, Vc, zero_row, Vb, o1):
    """Kernel body for a fixed block geometry (all Python ints)."""
    n_out = Bb * L
    f32 = jnp.float32
    hi = lax.Precision.HIGHEST

    def kernel(idx_ref, tab_ref, pe_ref, out_ref):
        blk = idx_ref[0]                                   # (R, 1) int32, one DMA per step
        tgtv = blk[:n_out]                                 # raw tgt values, output row order
        pos = blk[o1:o1 + n_out]                           # pos_index values

        inv = pe_ref[0:1, :]                               # (1/div_term) mod 2*pi, 0 beyond H
        phase = pe_ref[1:2, :]                             # 0 | pi/2 (cos half) | 0 padding

        def pe(col):                                       # (N,1) int -> (N,Hpad) sin/cos PE
            return jnp.sin(col.astype(f32) * inv + phase)

        # Per-row role, derived from the position inside each sequence.
        row = lax.broadcasted_iota(jnp.int32, (n_out, 1), 0) % L
        is_odd = (row % 2) == 1                            # mono token rows
        is_even = jnp.logical_and((row % 2) == 0, row > 0)  # parent / PE rows

        # Fused BOS / mono / zero lookup directly in output row order.  This is
        # the only MXU op; K = padded vocab is tiny so HIGHEST is free.
        lkp_idx = jnp.where(is_odd, Vb + tgtv,
                            jnp.where(is_even, zero_row, tgtv))
        oh = (lax.broadcasted_iota(jnp.int32, (n_out, Vc), 1) == lkp_idx).astype(f32)
        lkp = jnp.dot(oh, tab_ref[...], preferred_element_type=f32, precision=hi)

        # Parent gather: per-sequence select over the BOS/mono source rows
        # (block diagonal, VPU only).  Parents pointing at even rows land on the
        # zero rows of `lkp`, matching the reference's gather-from-unwritten-rows
        # semantics.  Garbage selections at non-even rows are masked out below.
        lkp3 = lkp.reshape(Bb, L, Hpad)
        src3 = tgtv.reshape(Bb, L, 1)
        parent = jnp.zeros((Bb, L, Hpad), f32)
        for k in [0] + list(range(1, L, 2)):               # 1 + (L-1)//2 static iterations
            parent = jnp.where(src3 == k, lkp3[:, k:k + 1, :], parent)

        even = is_even.astype(f32)                         # (n_out, 1) mask for parent rows
        out = lkp + even * (parent.reshape(n_out, Hpad) + pe(tgtv)) + pe(pos)
        out_ref[...] = out[None]                           # (1, n_out, Hpad) lane-dense store

    return kernel


def glycan_seq_embedding(tgt, pos_index, bos_table, tok_table, hidden_size,
                         lambda_max=10000.0, lambda_min=1e-5, block_b=None):
    B, L = tgt.shape
    H = int(hidden_size)
    assert H % 2 == 0, "sin/cos positional embedding needs an even hidden size"
    assert L >= 3 and L % 2 == 1, "expects BOS + alternating (mono, parent) positions"
    Vb = int(bos_table.shape[0])          # == 1 for this module (bos ids must be 0)
    V = int(tok_table.shape[0])
    Vc0 = Vb + V
    zero_row = Vc0                        # dedicated all-zero table row (even positions)
    Vc = _ru(Vc0 + 1, 8)
    Hpad = _ru(H, 128)                    # lane-dense output / table columns

    try:
        vmem_cap = int(pltpu.get_tpu_info().vmem_capacity_bytes)
    except Exception:
        vmem_cap = 64 * 1024 * 1024       # v7x per-TC budget is the smallest generation

    # ---- batch blocking ------------------------------------------------------
    row_bytes = L * Hpad * 4
    if block_b is None:
        Bb = max(1, (2 << 20) // row_bytes)          # ~2 MiB of output per grid step
        # double-buffered output + packed-index column (lane-padded) + temporaries
        per_b = 14 * row_bytes + 2 * (2 * L) * 512
        Bb = min(Bb, max(1, int(0.45 * vmem_cap) // per_b))
        if B >= 2:
            Bb = min(Bb, -(-B // 2))                 # nb >= 2 so both v7x TCs get work
        Bb = min(Bb, B)
        if Bb >= 8:
            Bb = _ru(Bb, 8)
    else:
        Bb = max(1, min(int(block_b), B))
    nb = -(-B // Bb)
    Bpad = nb * Bb

    tgt = jnp.asarray(tgt, jnp.int32)
    pos_index = jnp.asarray(pos_index, jnp.int32)
    if Bpad != B:
        pad = Bpad - B
        tgt = jnp.concatenate([tgt, jnp.zeros((pad, L), jnp.int32)], axis=0)
        pos_index = jnp.concatenate([pos_index, jnp.zeros((pad, L), jnp.int32)], axis=0)

    # ---- packed int32 indices: ONE DMA per step, 8-aligned segments ----------
    def seg(x):
        x = x.reshape(nb, -1)
        p = (-x.shape[1]) % 8
        return jnp.pad(x, ((0, 0), (0, p))) if p else x

    s_tgt, s_pos = seg(tgt), seg(pos_index)
    o1 = s_tgt.shape[1]
    packed = jnp.concatenate([s_tgt, s_pos], axis=1).astype(jnp.int32)
    R = packed.shape[1]
    packed = packed.reshape(nb, R, 1)

    # ---- grid-invariant constants (host-built, VMEM-resident) ----------------
    base = lambda_max / (2.0 * np.pi)
    scale = lambda_min / lambda_max
    div = base * scale ** (np.arange(0, H, 2, dtype=np.float64) / H)
    inv = np.mod(1.0 / div, 2.0 * np.pi)             # integer positions => mod-2*pi safe
    inv_full = np.zeros((Hpad,), np.float64)
    inv_full[:H] = np.concatenate([inv, inv])
    phase = np.zeros((Hpad,), np.float64)
    phase[H // 2:H] = np.pi / 2.0                    # cos(x) == sin(x + pi/2)
    pe_const = jnp.asarray(np.stack([inv_full, phase]).astype(np.float32))   # (2, Hpad)

    tab = jnp.zeros((Vc, Hpad), jnp.float32)         # [bos; tok; zero] lookup table
    tab = tab.at[:Vb, :H].set(jnp.asarray(bos_table, jnp.float32))
    tab = tab.at[Vb:Vc0, :H].set(jnp.asarray(tok_table, jnp.float32))

    # ---- VMEM budget derived from the block geometry -------------------------
    n_out = Bb * L
    out_bytes = n_out * Hpad * 4
    idx_bytes = R * 128 * 4                          # (R,1) column lane-pads to 128 in VMEM
    const_bytes = (Vc + 2) * Hpad * 4
    est = 2 * (out_bytes + idx_bytes) + 2 * const_bytes + 12 * out_bytes + (2 << 20)
    vmem_limit = int(min(max(est, 32 << 20), int(0.85 * vmem_cap)))

    kernel = _make_kernel(Bb, L, Hpad, Vc, zero_row, Vb, o1)
    out = pl.pallas_call(
        kernel,
        out_shape=jax.ShapeDtypeStruct((nb, n_out, Hpad), jnp.float32),
        grid=(nb,),
        in_specs=[
            pl.BlockSpec((1, R, 1), lambda i: (i, 0, 0)),      # packed ints: one DMA/step
            pl.BlockSpec((Vc, Hpad), lambda i: (0, 0)),        # resident [bos; tok; 0] table
            pl.BlockSpec((2, Hpad), lambda i: (0, 0)),         # resident PE constants
        ],
        out_specs=pl.BlockSpec((1, n_out, Hpad), lambda i: (i, 0, 0)),
        compiler_params=pltpu.CompilerParams(
            dimension_semantics=("parallel",),
            vmem_limit_bytes=vmem_limit),
    )(packed, tab, pe_const)

    # free row-major reshape back to (B, L, H); drop batch / lane padding
    return out.reshape(Bpad, L, Hpad)[:B, :, :H]


def reference(tgt, pos_index, bos_table, tok_table, H,
              lambda_max=10000.0, lambda_min=1e-5):
    """NumPy reference mirroring the PyTorch forward (float64 div_term)."""
    tgt = np.asarray(tgt)
    pos_index = np.asarray(pos_index)
    bos = np.asarray(bos_table)
    tok = np.asarray(tok_table)
    B, L = tgt.shape
    base = lambda_max / (2.0 * np.pi)
    scale = lambda_min / lambda_max
    div = base * scale ** (np.arange(0, H, 2, dtype=np.float64) / H)

    def pe(p):
        ang = p[..., None].astype(np.float64) / div
        return np.concatenate([np.sin(ang), np.cos(ang)], axis=-1).astype(np.float32)

    mono = tgt[:, 1::2]
    par = tgt[:, 2::2]
    e = np.zeros((B, L, H), np.float32)
    e[:, 0, :] = bos[tgt[:, 0]]
    e[:, 1::2, :] = tok[mono]
    idx = np.broadcast_to(par[..., None], (B, par.shape[1], H))
    parent_emb = np.take_along_axis(e.copy(), idx, axis=1)
    e[:, 2::2, :] = pe(par) + parent_emb
    return e + pe(pos_index)


if __name__ == "__main__":
    B, L, H, V = 2, 9, 32, 8   # L = 1 + 2*n (BOS + alternating mono/parent)
    n = (L - 1) // 2

    key = jax.random.PRNGKey(0)
    k1, k2, k3, k4 = jax.random.split(key, 4)
    bos_table = jax.random.normal(k1, (1, H), jnp.float32)   # nn.Embedding(1, H)
    tok_table = jax.random.normal(k2, (V, H), jnp.float32)   # nn.Embedding(V, H)

    mono = jax.random.randint(k3, (B, n), 0, V)
    # parent of node j (at seq position 2+2j) points to an earlier position
    parent = jnp.stack(
        [jax.random.randint(jax.random.fold_in(k4, j), (B,), 0, 1 + 2 * j)
         for j in range(n)], axis=1)

    tgt = jnp.zeros((B, L), jnp.int32)
    tgt = tgt.at[:, 1::2].set(mono)
    tgt = tgt.at[:, 2::2].set(parent)
    pos_index = jnp.broadcast_to(jnp.arange(L, dtype=jnp.int32), (B, L))

    ref = reference(tgt, pos_index, bos_table, tok_table, H)

    # auto-sized block (Bb=1, nb=2 at this tiny B), plus explicit single- and
    # multi-sequence blocks to exercise both grid paths.
    for bb in (None, 1, 2):
        out = glycan_seq_embedding(tgt, pos_index, bos_table, tok_table, H, block_b=bb)
        out = jax.block_until_ready(out)
        err = float(np.max(np.abs(np.asarray(out) - ref)))
        # mod-2pi-reduced f32 angles keep the PE within ~1e-5 of the f64 reference
        assert err < 2e-3, f"max abs err (block_b={bb}) {err}"

    print("KERNEL_OK")
</pallas_src>

<mosaic_0001>
module attributes {stable_mosaic.version = 11 : i64} {
  func.func @kernel(%arg0: i32, %arg1: memref<1x32x1xi32, #tpu.memory_space<vmem>>, %arg2: memref<16x128xf32, #tpu.memory_space<vmem>>, %arg3: memref<2x128xf32, #tpu.memory_space<vmem>>, %arg4: memref<1x9x128xf32, #tpu.memory_space<vmem>>) attributes {dimension_semantics = [#tpu.dimension_semantics<parallel>], iteration_bounds = array<i64: 2>, scalar_prefetch = 0 : i64, scratch_operands = 0 : i64, tpu.core_type = #tpu.core_type<tc>, window_params = [{transform_indices = @transform_0, window_bounds = array<i64: 1, 32, 1>}, {pipeline_mode = #tpu.pipeline_mode<synchronous>, transform_indices = @transform_1, window_bounds = array<i64: 16, 128>}, {pipeline_mode = #tpu.pipeline_mode<synchronous>, transform_indices = @transform_2, window_bounds = array<i64: 2, 128>}, {transform_indices = @transform_3, window_bounds = array<i64: 1, 9, 128>}]} {
    %c0 = arith.constant 0 : index
    %c0_0 = arith.constant 0 : index
    %c0_1 = arith.constant 0 : index
    %0 = vector.load %arg1[%c0, %c0_0, %c0_1] : memref<1x32x1xi32, #tpu.memory_space<vmem>>, vector<1x32x1xi32>
    %1 = vector.shape_cast %0 : vector<1x32x1xi32> to vector<32x1xi32>
    %2 = vector.extract_strided_slice %1 {offsets = [0, 0], sizes = [9, 1], strides = [1, 1]} : vector<32x1xi32> to vector<9x1xi32>
    %3 = vector.extract_strided_slice %1 {offsets = [16, 0], sizes = [9, 1], strides = [1, 1]} : vector<32x1xi32> to vector<9x1xi32>
    %c0_2 = arith.constant 0 : index
    %c0_3 = arith.constant 0 : index
    %4 = vector.load %arg3[%c0_2, %c0_3] : memref<2x128xf32, #tpu.memory_space<vmem>>, vector<1x128xf32>
    %c1 = arith.constant 1 : index
    %c0_4 = arith.constant 0 : index
    %5 = vector.load %arg3[%c1, %c0_4] : memref<2x128xf32, #tpu.memory_space<vmem>>, vector<1x128xf32>
    %6 = tpu.iota {dimensions = array<i32: 0>} : vector<9x1xi32>
    %c9_i32 = arith.constant 9 : i32
    %c0_i32 = arith.constant 0 : i32
    %7 = arith.cmpi eq, %c9_i32, %c0_i32 : i32
    %c1_i32 = arith.constant 1 : i32
    %8 = arith.select %7, %c1_i32, %c9_i32 : i32
    %9 = vector.broadcast %8 : i32 to vector<9x1xi32>
    %10 = arith.remsi %6, %9 : vector<9x1xi32>
    %c0_i32_5 = arith.constant 0 : i32
    %11 = vector.broadcast %c0_i32_5 : i32 to vector<9x1xi32>
    %12 = arith.cmpi ne, %10, %11 : vector<9x1xi32>
    %c0_i32_6 = arith.constant 0 : i32
    %13 = vector.broadcast %c0_i32_6 : i32 to vector<9x1xi32>
    %14 = arith.cmpi slt, %10, %13 : vector<9x1xi32>
    %c0_i32_7 = arith.constant 0 : i32
    %15 = arith.cmpi slt, %8, %c0_i32_7 : i32
    %16 = vector.broadcast %15 : i1 to vector<9x1xi1>
    %17 = vector.broadcast %16 : vector<9x1xi1> to vector<9x1xi1>
    %18 = arith.xori %14, %17 : vector<9x1xi1>
    %19 = arith.andi %18, %12 : vector<9x1xi1>
    %20 = vector.broadcast %8 : i32 to vector<9x1xi32>
    %21 = arith.addi %10, %20 : vector<9x1xi32>
    %22 = arith.select %19, %21, %10 : vector<9x1xi1>, vector<9x1xi32>
    %c2_i32 = arith.constant 2 : i32
    %c0_i32_8 = arith.constant 0 : i32
    %23 = arith.cmpi eq, %c2_i32, %c0_i32_8 : i32
    %c1_i32_9 = arith.constant 1 : i32
    %24 = arith.select %23, %c1_i32_9, %c2_i32 : i32
    %25 = vector.broadcast %24 : i32 to vector<9x1xi32>
    %26 = arith.remsi %22, %25 : vector<9x1xi32>
    %c0_i32_10 = arith.constant 0 : i32
    %27 = vector.broadcast %c0_i32_10 : i32 to vector<9x1xi32>
    %28 = arith.cmpi ne, %26, %27 : vector<9x1xi32>
    %c0_i32_11 = arith.constant 0 : i32
    %29 = vector.broadcast %c0_i32_11 : i32 to vector<9x1xi32>
    %30 = arith.cmpi slt, %26, %29 : vector<9x1xi32>
    %c0_i32_12 = arith.constant 0 : i32
    %31 = arith.cmpi slt, %24, %c0_i32_12 : i32
    %32 = vector.broadcast %31 : i1 to vector<9x1xi1>
    %33 = vector.broadcast %32 : vector<9x1xi1> to vector<9x1xi1>
    %34 = arith.xori %30, %33 : vector<9x1xi1>
    %35 = arith.andi %34, %28 : vector<9x1xi1>
    %36 = vector.broadcast %24 : i32 to vector<9x1xi32>
    %37 = arith.addi %26, %36 : vector<9x1xi32>
    %38 = arith.select %35, %37, %26 : vector<9x1xi1>, vector<9x1xi32>
    %c1_i32_13 = arith.constant 1 : i32
    %39 = vector.broadcast %c1_i32_13 : i32 to vector<9x1xi32>
    %40 = arith.cmpi eq, %38, %39 : vector<9x1xi32>
    %c2_i32_14 = arith.constant 2 : i32
    %c0_i32_15 = arith.constant 0 : i32
    %41 = arith.cmpi eq, %c2_i32_14, %c0_i32_15 : i32
    %c1_i32_16 = arith.constant 1 : i32
    %42 = arith.select %41, %c1_i32_16, %c2_i32_14 : i32
    %43 = vector.broadcast %42 : i32 to vector<9x1xi32>
    %44 = arith.remsi %22, %43 : vector<9x1xi32>
    %c0_i32_17 = arith.constant 0 : i32
    %45 = vector.broadcast %c0_i32_17 : i32 to vector<9x1xi32>
    %46 = arith.cmpi ne, %44, %45 : vector<9x1xi32>
    %c0_i32_18 = arith.constant 0 : i32
    %47 = vector.broadcast %c0_i32_18 : i32 to vector<9x1xi32>
    %48 = arith.cmpi slt, %44, %47 : vector<9x1xi32>
    %c0_i32_19 = arith.constant 0 : i32
    %49 = arith.cmpi slt, %42, %c0_i32_19 : i32
    %50 = vector.broadcast %49 : i1 to vector<9x1xi1>
    %51 = vector.broadcast %50 : vector<9x1xi1> to vector<9x1xi1>
    %52 = arith.xori %48, %51 : vector<9x1xi1>
    %53 = arith.andi %52, %46 : vector<9x1xi1>
    %54 = vector.broadcast %42 : i32 to vector<9x1xi32>
    %55 = arith.addi %44, %54 : vector<9x1xi32>
    %56 = arith.select %53, %55, %44 : vector<9x1xi1>, vector<9x1xi32>
    %c0_i32_20 = arith.constant 0 : i32
    %57 = vector.broadcast %c0_i32_20 : i32 to vector<9x1xi32>
    %58 = arith.cmpi eq, %56, %57 : vector<9x1xi32>
    %c0_i32_21 = arith.constant 0 : i32
    %59 = vector.broadcast %c0_i32_21 : i32 to vector<9x1xi32>
    %60 = arith.cmpi sgt, %22, %59 : vector<9x1xi32>
    %61 = arith.andi %58, %60 : vector<9x1xi1>
    %c1_i32_22 = arith.constant 1 : i32
    %62 = vector.broadcast %c1_i32_22 : i32 to vector<9x1xi32>
    %63 = arith.addi %62, %2 : vector<9x1xi32>
    %c9_i32_23 = arith.constant 9 : i32
    %64 = vector.broadcast %c9_i32_23 : i32 to vector<9x1xi32>
    %65 = arith.select %61, %64, %2 : vector<9x1xi1>, vector<9x1xi32>
    %66 = arith.select %40, %63, %65 : vector<9x1xi1>, vector<9x1xi32>
    %67 = tpu.iota {dimensions = array<i32: 1>} : vector<9x16xi32>
    %68 = vector.broadcast %66 : vector<9x1xi32> to vector<9x16xi32>
    %69 = arith.cmpi eq, %67, %68 : vector<9x16xi32>
    %70 = arith.extui %69 : vector<9x16xi1> to vector<9x16xi32>
    %71 = arith.sitofp %70 : vector<9x16xi32> to vector<9x16xf32>
    %c0_24 = arith.constant 0 : index
    %c0_25 = arith.constant 0 : index
    %72 = vector.load %arg2[%c0_24, %c0_25] : memref<16x128xf32, #tpu.memory_space<vmem>>, vector<16x128xf32>
    %cst = arith.constant dense<0.000000e+00> : vector<9x128xf32>
    %73 = tpu.matmul %71, %72, %cst {dimension_numbers = #tpu.dot_dimension_numbers<[1], [0], [0], [1], [0, 0, 1, 1], [], []>, precision = #tpu.contract_precision<fp32>} : vector<9x16xf32>, vector<16x128xf32>, vector<9x128xf32> -> vector<9x128xf32>
    %74 = vector.shape_cast %73 : vector<9x128xf32> to vector<1x9x128xf32>
    %75 = vector.shape_cast %2 : vector<9x1xi32> to vector<1x9x1xi32>
    %cst_26 = arith.constant 0.000000e+00 : f32
    %76 = vector.broadcast %cst_26 : f32 to vector<1x9x128xf32>
    %c0_i32_27 = arith.constant 0 : i32
    %77 = vector.broadcast %c0_i32_27 : i32 to vector<1x9x1xi32>
    %78 = arith.cmpi eq, %75, %77 : vector<1x9x1xi32>
    %79 = vector.extract_strided_slice %74 {offsets = [0, 0, 0], sizes = [1, 1, 128], strides = [1, 1, 1]} : vector<1x9x128xf32> to vector<1x1x128xf32>
    %80 = vector.shape_cast %78 : vector<1x9x1xi1> to vector<1x9x1xi1>
    %81 = vector.broadcast %80 : vector<1x9x1xi1> to vector<1x9x128xi1>
    %82 = vector.shape_cast %79 : vector<1x1x128xf32> to vector<1x1x128xf32>
    %83 = vector.broadcast %82 : vector<1x1x128xf32> to vector<1x9x128xf32>
    %84 = arith.select %81, %83, %76 : vector<1x9x128xi1>, vector<1x9x128xf32>
    %c1_i32_28 = arith.constant 1 : i32
    %85 = vector.broadcast %c1_i32_28 : i32 to vector<1x9x1xi32>
    %86 = arith.cmpi eq, %75, %85 : vector<1x9x1xi32>
    %87 = vector.extract_strided_slice %74 {offsets = [0, 1, 0], sizes = [1, 1, 128], strides = [1, 1, 1]} : vector<1x9x128xf32> to vector<1x1x128xf32>
    %88 = vector.shape_cast %86 : vector<1x9x1xi1> to vector<1x9x1xi1>
    %89 = vector.broadcast %88 : vector<1x9x1xi1> to vector<1x9x128xi1>
    %90 = vector.shape_cast %87 : vector<1x1x128xf32> to vector<1x1x128xf32>
    %91 = vector.broadcast %90 : vector<1x1x128xf32> to vector<1x9x128xf32>
    %92 = arith.select %89, %91, %84 : vector<1x9x128xi1>, vector<1x9x128xf32>
    %c3_i32 = arith.constant 3 : i32
    %93 = vector.broadcast %c3_i32 : i32 to vector<1x9x1xi32>
    %94 = arith.cmpi eq, %75, %93 : vector<1x9x1xi32>
    %95 = vector.extract_strided_slice %74 {offsets = [0, 3, 0], sizes = [1, 1, 128], strides = [1, 1, 1]} : vector<1x9x128xf32> to vector<1x1x128xf32>
    %96 = vector.shape_cast %94 : vector<1x9x1xi1> to vector<1x9x1xi1>
    %97 = vector.broadcast %96 : vector<1x9x1xi1> to vector<1x9x128xi1>
    %98 = vector.shape_cast %95 : vector<1x1x128xf32> to vector<1x1x128xf32>
    %99 = vector.broadcast %98 : vector<1x1x128xf32> to vector<1x9x128xf32>
    %100 = arith.select %97, %99, %92 : vector<1x9x128xi1>, vector<1x9x128xf32>
    %c5_i32 = arith.constant 5 : i32
    %101 = vector.broadcast %c5_i32 : i32 to vector<1x9x1xi32>
    %102 = arith.cmpi eq, %75, %101 : vector<1x9x1xi32>
    %103 = vector.extract_strided_slice %74 {offsets = [0, 5, 0], sizes = [1, 1, 128], strides = [1, 1, 1]} : vector<1x9x128xf32> to vector<1x1x128xf32>
    %104 = vector.shape_cast %102 : vector<1x9x1xi1> to vector<1x9x1xi1>
    %105 = vector.broadcast %104 : vector<1x9x1xi1> to vector<1x9x128xi1>
    %106 = vector.shape_cast %103 : vector<1x1x128xf32> to vector<1x1x128xf32>
    %107 = vector.broadcast %106 : vector<1x1x128xf32> to vector<1x9x128xf32>
    %108 = arith.select %105, %107, %100 : vector<1x9x128xi1>, vector<1x9x128xf32>
    %c7_i32 = arith.constant 7 : i32
    %109 = vector.broadcast %c7_i32 : i32 to vector<1x9x1xi32>
    %110 = arith.cmpi eq, %75, %109 : vector<1x9x1xi32>
    %111 = vector.extract_strided_slice %74 {offsets = [0, 7, 0], sizes = [1, 1, 128], strides = [1, 1, 1]} : vector<1x9x128xf32> to vector<1x1x128xf32>
    %112 = vector.shape_cast %110 : vector<1x9x1xi1> to vector<1x9x1xi1>
    %113 = vector.broadcast %112 : vector<1x9x1xi1> to vector<1x9x128xi1>
    %114 = vector.shape_cast %111 : vector<1x1x128xf32> to vector<1x1x128xf32>
    %115 = vector.broadcast %114 : vector<1x1x128xf32> to vector<1x9x128xf32>
    %116 = arith.select %113, %115, %108 : vector<1x9x128xi1>, vector<1x9x128xf32>
    %117 = arith.extui %61 : vector<9x1xi1> to vector<9x1xi32>
    %118 = arith.sitofp %117 : vector<9x1xi32> to vector<9x1xf32>
    %119 = vector.shape_cast %116 : vector<1x9x128xf32> to vector<9x128xf32>
    %120 = arith.sitofp %2 : vector<9x1xi32> to vector<9x1xf32>
    %121 = vector.broadcast %120 : vector<9x1xf32> to vector<9x128xf32>
    %122 = vector.broadcast %4 : vector<1x128xf32> to vector<9x128xf32>
    %123 = arith.mulf %121, %122 : vector<9x128xf32>
    %124 = vector.broadcast %5 : vector<1x128xf32> to vector<9x128xf32>
    %125 = arith.addf %123, %124 : vector<9x128xf32>
    %126 = math.sin %125 : vector<9x128xf32>
    %127 = arith.addf %119, %126 : vector<9x128xf32>
    %128 = vector.broadcast %118 : vector<9x1xf32> to vector<9x128xf32>
    %129 = arith.mulf %128, %127 : vector<9x128xf32>
    %130 = arith.addf %73, %129 : vector<9x128xf32>
    %131 = arith.sitofp %3 : vector<9x1xi32> to vector<9x1xf32>
    %132 = vector.broadcast %131 : vector<9x1xf32> to vector<9x128xf32>
    %133 = vector.broadcast %4 : vector<1x128xf32> to vector<9x128xf32>
    %134 = arith.mulf %132, %133 : vector<9x128xf32>
    %135 = vector.broadcast %5 : vector<1x128xf32> to vector<9x128xf32>
    %136 = arith.addf %134, %135 : vector<9x128xf32>
    %137 = math.sin %136 : vector<9x128xf32>
    %138 = arith.addf %130, %137 : vector<9x128xf32>
    %139 = vector.shape_cast %138 : vector<9x128xf32> to vector<1x9x128xf32>
    %c0_29 = arith.constant 0 : index
    %c0_30 = arith.constant 0 : index
    %c0_31 = arith.constant 0 : index
    %140 = vector.load %arg4[%c0_29, %c0_30, %c0_31] : memref<1x9x128xf32, #tpu.memory_space<vmem>>, vector<1x9x128xf32>
    tpu.vector_store %arg4[%c0_29, %c0_30, %c0_31], %139 {strides = array<i32>} : memref<1x9x128xf32, #tpu.memory_space<vmem>>, vector<1x9x128xf32>,
    return
  }
  func.func @transform_0(%arg0: i32) -> (i32, i32, i32) {
    %c0_i32 = arith.constant 0 : i32
    %c0_i32_0 = arith.constant 0 : i32
    %c0_i32_1 = arith.constant 0 : i32
    return %arg0, %c0_i32, %c0_i32_0 : i32, i32, i32
  }
  func.func @transform_1(%arg0: i32) -> (i32, i32) {
    %c0_i32 = arith.constant 0 : i32
    %c0_i32_0 = arith.constant 0 : i32
    %c0_i32_1 = arith.constant 0 : i32
    return %c0_i32, %c0_i32_0 : i32, i32
  }
  func.func @transform_2(%arg0: i32) -> (i32, i32) {
    %c0_i32 = arith.constant 0 : i32
    %c0_i32_0 = arith.constant 0 : i32
    %c0_i32_1 = arith.constant 0 : i32
    return %c0_i32, %c0_i32_0 : i32, i32
  }
  func.func @transform_3(%arg0: i32) -> (i32, i32, i32) {
    %c0_i32 = arith.constant 0 : i32
    %c0_i32_0 = arith.constant 0 : i32
    %c0_i32_1 = arith.constant 0 : i32
    return %arg0, %c0_i32, %c0_i32_0 : i32, i32, i32
  }
}

</mosaic_0001>

<bundles_post_ra>
// kernel: tpu_custom_call.1
= control target key start
LH: loop header
LB: loop body
LE: loop exit
PB: predicated region body
PF: predicated region fallthrough
CT: control target
= control target key end

     0   :  { %s1623_s12 = smov 0   ;;  %s2225_s0 = inlined_call_operand.vmem [shape: s32[2,32,1], index: 0, kind: input, shape index: {}]   ;;  %s2226_s1 = inlined_call_operand.vmem [shape: f32[16,128], index: 1, kind: input, shape index: {}]   ;;  %s2227_s2 = inlined_call_operand.vmem [shape: f32[2,128], index: 2, kind: input, shape index: {}]   ;;  %s2228_s3 = inlined_call_operand.vmem [shape: f32[2,9,128], index: 3, kind: output, shape index: {}]  }
   0x1 LB: > { %s1390_s13 = sadd.s32 4294967295, %s1593_s12   ;;  %p1394_p0 = scmp.ge.s32.totalorder %s1593_s12, 1  ;;  %s1593_s12 = sphi %s1623_s12, %s13_s12  }
   0x2   : > { %p137_p1 = scmp.lt.s32.totalorder %s1593_s12, 3 }
   0x4   : > { %p138_p2 = pnand %p1394_p0, %p137_p1 }
   0x5   : > { %p161_p3 = scmp.lt.s32.totalorder (!%p138_p2), %s1390_s13, 1  ;;  %v177_v0 = vlaneseq (!%p138_p2)  ;;  %v1595_v1 = vmov (!%p138_p2), 0   ;;  %v264_v47 = vld [vmem:[%s2226_s1] sm:$0xff] (!%p138_p2)  ;;  %v265_v48 = vld [vmem:[%s2226_s1 + $0x8] sm:$0xff] (!%p138_p2) }
   0x6   : > { %141 = sbr.rel (%p138_p2) target bundleno = 427 (0x1ab), region = 32  ;;  %1569 = vset.pattern.permute.xlu0 (!%p138_p2), %v1595_v1  ;;  %1570 = vset.pattern.permute.xlu1 (!%p138_p2), %v1595_v1  ;;  %v274_v49 = vand.u32 (!%p138_p2), 4294901760, %v264_v47  ;;  %v277_v50 = vand.u32 (!%p138_p2), 4294901760, %v265_v48 }
   0x7   : > { %v1636_v2 = vshrl.u32 (!%p138_p2), %v177_v0, 7 }
   0x8   : > { %v1687_v52 = vpack.c.bf16 (!%p138_p2), %v277_v50, %v274_v49  ;;  %v362_v54 = vsub.f32 (!%p138_p2), %v264_v47, %v274_v49  ;;  %v369_v55 = vsub.f32 (!%p138_p2), %v265_v48, %v277_v50 }
   0x9   : > { %v1640_v3 = vmul.u32.u64.low (!%p138_p2), 3817748708, %v1636_v2  ;;  %v1641_v4 = vmul.u32.u64.high 3817748708, %v1636_v2, %v1640_v3  ;;  %v179_v5 = vadd.s32 (!%p138_p2), 8, %v1636_v2 }
   0xa   : > { %1512 = vmatprep.subr.bf16.mxu0 (!%p138_p2), %v1687_v52  ;;  %1500 = vmatprep.subr.bf16.mxu1 (!%p138_p2), %v1687_v52  ;;  %v363_v57 = vand.u32 (!%p138_p2), 4294901760, %v362_v54  ;;  %v370_v58 = vand.u32 (!%p138_p2), 4294901760, %v369_v55 }
   0xb   : > { %v1644_v6 = vmul.u32.u64.low (!%p138_p2), 3817748708, %v179_v5  ;;  %v1645_v7 = vmul.u32.u64.high 3817748708, %v179_v5, %v1644_v6  ;;  %v186_v8 = vshrl.u32 (!%p138_p2), %v1641_v4, 3  ;;  %1514 = vmatpush3.bf16.msra.mxu0 (!%p138_p2), %v1687_v52  ;;  %1502 = vmatpush3.bf16.msra.mxu1 (!%p138_p2), %v1687_v52 }
   0xc   : > { %v364_v59 = vsub.f32 (!%p138_p2), %v362_v54, %v363_v57  ;;  %v371_v60 = vsub.f32 (!%p138_p2), %v369_v55, %v370_v58  ;;  %v1515_v61 = vpack.c.bf16 (!%p138_p2), %v370_v58, %v363_v57  ;;  %v1599_v58 = vmov (!%p138_p2), 1326507024  }
   0xd   : > { %s2243_s13 = smov (!%p161_p3, %s1390_s13), 1  ;;  %v187_v10 = vmul.u32 9, %v186_v8  ;;  %v197_v11 = vshrl.u32 %v1645_v7, 3  ;;  %v1507_v8 = vpack.c.bf16 %v369_v55, %v362_v54  ;;  %v1598_v54 = vmov 920167782  }
   0xe   : > { %s1431_s14 = sshll.u32 %s2243_s13, 5  ;;  %v365_v63 = vand.u32 4294901760, %v364_v59  ;;  %v372_v3 = vand.u32 4294901760, %v371_v60  ;;  %1516 = vmatprep.subr.bf16.mxu0 %v1515_v61  ;;  %s1432_s26 = sshll.u32 %s2243_s13, 4 }
   0xf   : > { %s1650_s17 = scalar_lea.vmem %s2225_s0, %s1431_s14  ;;  %v188_v13 = vsub.s32 %v1636_v2, %v187_v10  ;;  %v198_v15 = vmul.u32 9, %v197_v11  ;;  %s170_s29 = scalar_lea.vmem %s2228_s3, %s1432_s26 }
  0x10   : > { %v1654_v9 = vld [vmem:[%s1650_s17] sm:$0xff]  ;;  %v1660_v14 = vld [vmem:[%s1650_s17 + $0x8] sm:$0xff]  ;;  %v174_v19 = vld [vmem:[%s1650_s17 + $0x18] sm:$0xff]  ;;  %v1503_v4 = vpack.c.bf16 %v372_v3, %v365_v63  ;;  %v1601_v63 = vmov 2475754826  }
  0x11   : > { %v869_v12 = vcvt.s32.f32 %v1654_v9  ;;  %v870_v16 = vcvt.s32.f32 %v1660_v14  ;;  %vm202_vm0 = vcmp.ne.s32.totalorder %v188_v13, 0  ;;  %vm204_vm1 = vcmp.lt.s32.totalorder %v188_v13, 0  ;;  %v173_v46 = vld [vmem:[%s1650_s17 + $0x10] sm:$0xff] }
  0x12   : > { %v208_v17 = vadd.s32 9, %v188_v13  ;;  %v199_v18 = vsub.s32 %v179_v5, %v198_v15  ;;  %vm206_vm2 = vmand %vm204_vm1, %vm202_vm0  ;;  %v1108_v23 = vcvt.s32.f32 %v174_v19  ;;  %v244_v34 = vadd.s32 1, %v1654_v9  ;;  %1504 = vmatprep.subr.bf16.mxu1 %v1503_v4 }
  0x13   : > { %873 = vperm.xlu1 %1570, %v869_v12   ;;  %v245_v40 = vadd.s32 1, %v1660_v14  ;;  %v1107_v51 = vcvt.s32.f32 %v173_v46 }
  0x14   : > { %v210_v20 = vsel %vm206_vm2, %v208_v17, %v188_v13  ;;  %vm203_vm3 = vcmp.ne.s32.totalorder %v199_v18, 0  ;;  %vm205_vm4 = vcmp.lt.s32.totalorder %v199_v18, 0  ;;  %v209_v21 = vadd.s32 9, %v199_v18 }
  0x15   : > { %v213_v22 = vsub.s32 0, %v210_v20  ;;  %vm207_vm5 = vmand %vm205_vm4, %vm203_vm3  ;;  %vm212_vm6 = vcmp.lt.s32.totalorder %v210_v20, 0  ;;  %vm240_vm11 = vcmp.gt.s32.totalorder %v210_v20, 0  ;;  %v251_v13 = vand.u32 127, %v177_v0 }
  0x16   : > { %v211_v24 = vsel %vm207_vm5, %v209_v21, %v199_v18 }
  0x17   : > { %878 = vperm.xlu1 %1570, %v870_v16   ;;  %v1399_v25 = vmin.u32 %v213_v22, %v210_v20  ;;  %v220_v26 = vsub.s32 0, %v211_v24  ;;  %vm219_vm7 = vcmp.lt.s32.totalorder %v211_v24, 0  ;;  %vm241_vm1 = vcmp.gt.s32.totalorder %v211_v24, 0 }
  0x18   : > { %v1596_v16 = vmov 0.0  }
  0x19   : > { %v216_v27 = vand.u32 1, %v1399_v25  ;;  %v1400_v28 = vmin.u32 %v220_v26, %v211_v24 }
  0x1b   : > { %1116 = vperm.xlu1 %1570, %v1108_v23   ;;  %v217_v29 = vsub.s32 0, %v216_v27  ;;  %v223_v30 = vand.u32 1, %v1400_v28 }
  0x1d   : > { %v218_v31 = vsel %vm212_vm6, %v217_v29, %v216_v27  ;;  %v224_v32 = vsub.s32 0, %v223_v30  ;;  %vm775_vm6 = vcmp.eq.s32.totalorder %v1654_v9, 0  ;;  %v1411_v27 = vld [vmem:[%s2227_s2] ss:$0 sm:$0xff] }
  0x1e   : > { %vm226_vm8 = vcmp.ne.s32.totalorder %v218_v31, 0  ;;  %vm228_vm9 = vcmp.lt.s32.totalorder %v218_v31, 0  ;;  %v232_v33 = vadd.s32 2, %v218_v31  ;;  %v777_v53 = vsel %vm775_vm6, 1, %v1595_v1 }
  0x1f   : > { %vm230_vm10 = vmand %vm228_vm9, %vm226_vm8  ;;  %v225_v35 = vsel %vm219_vm7, %v224_v32, %v223_v30  ;;  %vm793_vm7 = vcmp.eq.s32.totalorder %v1654_v9, 1  ;;  %vm811_vm8 = vcmp.eq.s32.totalorder %v1654_v9, 3  ;;  %vm829_vm9 = vcmp.eq.s32.totalorder %v1654_v9, 5  ;;  %v1412_v30 = vld [vmem:[%s2227_s2 + $0x1] ss:$0 sm:$0xff] }
  0x20   : > { %v234_v36 = vsel %vm230_vm10, %v232_v33, %v218_v31  ;;  %vm227_vm12 = vcmp.ne.s32.totalorder %v225_v35, 0  ;;  %vm229_vm13 = vcmp.lt.s32.totalorder %v225_v35, 0  ;;  %v233_v37 = vadd.s32 2, %v225_v35 }
  0x21   : > { %vm236_vm14 = vcmp.eq.s32.totalorder %v234_v36, 1  ;;  %vm238_vm15 = vcmp.eq.s32.totalorder %v234_v36, 0  ;;  %vm231_vm0 = vmand %vm229_vm13, %vm227_vm12  ;;  %v795_v56 = vsel %vm793_vm7, 1, %v1595_v1  ;;  %v813_v62 = vsel %vm811_vm8, 1, %v1595_v1 }
  0x22   : > { %vm1665_vm2 = vmand %vm238_vm15, %vm240_vm11  ;;  %v235_v39 = vsel %vm231_vm0, %v233_v37, %v225_v35  ;;  %v831_v5 = vsel %vm829_vm9, 1, %v1595_v1  ;;  %vm847_vm10 = vcmp.eq.s32.totalorder %v1654_v9, 7  ;;  %vm776_vm11 = vcmp.eq.s32.totalorder %v1660_v14, 0 }
  0x23   : > { %v246_v41 = vsel %vm1665_vm2, 9, %v1654_v9  ;;  %vm237_vm3 = vcmp.eq.s32.totalorder %v235_v39, 1  ;;  %vm239_vm4 = vcmp.eq.s32.totalorder %v235_v39, 0  ;;  %v778_v6 = vsel %vm776_vm11, 1, %v1595_v1 }
  0x24   : > { %v248_v42 = vsel %vm236_vm14, %v244_v34, %v246_v41  ;;  %vm1673_vm5 = vmand %vm239_vm4, %vm241_vm1  ;;  %783 = vperm.xlu1 %1570, %v778_v6   ;;  %v849_v7 = vsel %vm847_vm10, 1, %v1595_v1  ;;  %vm794_vm12 = vcmp.eq.s32.totalorder %v1660_v14, 1  ;;  %vm812_vm13 = vcmp.eq.s32.totalorder %v1660_v14, 3 }
  0x25   : > { %253 = vperm.xlu0 %1569, %v248_v42   ;;  %v247_v44 = vsel %vm1673_vm5, 9, %v1660_v14  ;;  %v796_v10 = vsel %vm794_vm12, 1, %v1595_v1  ;;  %v814_v9 = vsel %vm812_vm13, 1, %v1595_v1  ;;  %vm830_vm14 = vcmp.eq.s32.totalorder %v1660_v14, 5 }
  0x26   : > { %v249_v45 = vsel %vm237_vm3, %v245_v40, %v247_v44  ;;  %v832_v11 = vsel %vm830_vm14, 1, %v1595_v1  ;;  %vm848_vm15 = vcmp.eq.s32.totalorder %v1660_v14, 7  ;;  %vm266_vm0 = vcmask 130048  }
  0x27   : > { %v850_v12 = vsel %vm848_vm15, 1, %v1595_v1  ;;  %v1602_v6 = vmov 2131351028  }
  0x28   : > { %801 = vperm.xlu1 %1570, %v796_v10  }
  0x29   : > { %256 = vperm.xlu0 %1569, %v249_v45  }
  0x2c   : > { %819 = vperm.xlu1 %1570, %v814_v9  }
  0x2d   : > { %1111 = vperm.xlu0 %1569, %v1107_v51  }
  0x30   : > { %837 = vperm.xlu1 %1570, %v832_v11  }
  0x31   : > { %780 = vperm.xlu0 %1569, %v777_v53  }
  0x34   : > { %855 = vperm.xlu1 %1570, %v850_v12  }
  0x35   : > { %798 = vperm.xlu0 %1569, %v795_v56  }
  0x39   : > { %816 = vperm.xlu0 %1569, %v813_v62  }
  0x3d   : > { %834 = vperm.xlu0 %1569, %v831_v5  }
  0x41   : > { %852 = vperm.xlu0 %1569, %v849_v7  }
  0x92   : > { %v874_v28 = vpop.permute.xlu1 %873 }
  0x93   : > { %v885_v29 = vmul.f32 %v1411_v27, %v874_v28 }
  0x95   : > { %v1732_v31 = vadd.f32 %v1412_v30, %v885_v29 }
  0x96   : > { %v879_v36 = vpop.permute.xlu1 %878 }
  0x97   : > { %v896_v32 = vand.u32 2139095040, %v1732_v31  ;;  %v886_v40 = vmul.f32 %v1411_v27, %v879_v36  ;;  %v893_v51 = vand.u32 2147483647, %v1732_v31 }
  0x99   : > { %v897_v33 = vshrl.u32 %v896_v32, 23  ;;  %v1735_v44 = vadd.f32 %v1412_v30, %v886_v40  ;;  %v900_v12 = vand.u32 8388607, %v893_v51 }
  0x9a   : > { %v1117_v45 = vpop.permute.xlu1 %1116 }
  0x9b   : > { %v1413_v34 = vadd.s32 4294967169, %v897_v33  ;;  %v1000_v48 = vand.u32 2139095040, %v1735_v44  ;;  %v1120_v49 = vmul.f32 %v1411_v27, %v1117_v45 }
  0x9d   : > { %v903_v35 = vadd.s32 1, %v1413_v34  ;;  %v1001_v60 = vshrl.u32 %v1000_v48, 23 }
  0x9f   : > { %vm904_vm4 = vcmp.gt.s32.totalorder %v903_v35, 0 }
  0xa0   : > { %v905_v39 = vsel %vm904_vm4, %v903_v35, 0 }
  0xa1   : > { %v907_v42 = vand.u32 31, %v905_v39  ;;  %v1744_v56 = vshrl.u32 %v905_v39, 5 }
  0xa3   : > { %v908_v47 = vsub.s32 32, %v907_v42  ;;  %v922_v57 = vshll.u32 %v1598_v54, %v907_v42  ;;  %v913_v3 = vshll.u32 %v1601_v63, %v907_v42  ;;  %vm928_vm6 = vcmp.lt.s32.totalorder %v1744_v56, 4 }
  0xa4   : > { %v254_v15 = vpop.permute.xlu0 %253  ;;  %vm925_vm7 = vcmp.lt.s32.totalorder %v1744_v56, 1  ;;  %vm927_vm8 = vcmp.lt.s32.totalorder %v1744_v56, 3  ;;  %vm926_vm9 = vcmp.lt.s32.totalorder %v1744_v56, 2 }
  0xa5   : > { %vm258_vm1 = vcmp.eq.s32.totalorder %v251_v13, %v254_v15  ;;  %v920_v55 = vshrl.u32 %v1598_v54, %v908_v47  ;;  %v923_v59 = vshrl.u32 %v1599_v58, %v908_v47  ;;  %v911_v5 = vshrl.u32 %v1601_v63, %v908_v47 }
  0xa6   : > { %v1401_v17 = vsel %vm258_vm1, 1.0, %v1596_v16  ;;  %v914_v7 = vshrl.u32 %v1602_v6, %v908_v47  ;;  %v1417_v15 = vadd.s32 4294967169, %v1001_v60 }
  0xa7   : > { %v268_v18 = vsel %vm266_vm0, %v1401_v17, 0 }
  0xa8   : > { %v341_v19 = vsub.f32 %v268_v18, %v268_v18  ;;  %v257_v20 = vpop.permute.xlu0 %256  ;;  %v915_v18 = vor.u32 %v914_v7, %v913_v3 }
  0xa9   : > { %vm259_vm3 = vcmp.eq.s32.totalorder %v251_v13, %v257_v20  ;;  %v924_v13 = vor.u32 %v923_v59, %v922_v57 }
  0xaa   : > { %v1402_v21 = vsel %vm259_vm3, 1.0, %v1596_v16  ;;  %v342_v22 = vand.u32 4294901760, %v341_v19 }
  0xab   : > { %v271_v14 = vsel %vm266_vm0, %v1402_v21, 0 }
  0xac   : > { %v351_v1 = vsub.f32 %v271_v14, %v271_v14  ;;  %1482 = vmatprep.mubr.f32.mxu0 %v342_v22  ;;  %v343_v23 = vsub.f32 %v341_v19, %v342_v22  ;;  %v1112_v37 = vpop.permute.xlu0 %1111  ;;  %v901_v14 = vor.u32 8388608, %v900_v12 }
  0xad   : > { %v1119_v41 = vmul.f32 %v1411_v27, %v1112_v37 }
  0xae   : > { %v344_v0 = vand.u32 4294901760, %v343_v23  ;;  %v352_v24 = vand.u32 4294901760, %v351_v1  ;;  %v1007_v23 = vadd.s32 1, %v1417_v15  ;;  %v1775_v29 = vshll.u32 %v901_v14, 8 }
  0xaf   : > { %v1737_v46 = vadd.f32 %v1412_v30, %v1119_v41 }
  0xb0   : > { %1461 = vmatprep.mubr.f32.mxu1 %v344_v0  ;;  %1483 = vmatmul.mubr.f32.vlgmr.msra.gmra.mrb[0].mxu0 %v352_v24  ;;  %v353_v25 = vsub.f32 %v351_v1, %v352_v24  ;;  %vm1008_vm10 = vcmp.gt.s32.totalorder %v1007_v23, 0 }
  0xb1   : > { %1489 = vmatprep.mubr.msk.f32.mxu0 %vm266_vm0, %v1401_v17  ;;  %1518 = vmatpush3.bf16.msra.mxu0 %v1515_v61  ;;  %v1126_v50 = vand.u32 2139095040, %v1737_v46  ;;  %v1600_v61 = vmov 683565275   ;;  %v1009_v36 = vsel %vm1008_vm10, %v1007_v23, 0  ;;  %v1123_v59 = vand.u32 2147483647, %v1737_v46 }
  0xb2   : > { %v354_v26 = vand.u32 4294901760, %v353_v25  ;;  %1520 = vmatprep.subr.bf16.mxu0 %v1687_v52  ;;  %v910_v62 = vshll.u32 %v1600_v61, %v907_v42  ;;  %v909_v33 = vshrl.u32 %v1600_v61, %v908_v47 }
  0xb3   : > { %v1127_v9 = vshrl.u32 %v1126_v50, 23  ;;  %v1011_v50 = vand.u32 31, %v1009_v36 }
  0xb4   : > { %1462 = vmatmul.mubr.f32.vlgmr.msra.gmra.mrb[0].mxu1 %v354_v26 }
  0xb5   : > { %1506 = vmatpush3.bf16.msra.mxu1 %v1503_v4  ;;  %1468 = vmatprep.mubr.msk.f32.mxu1 %vm266_vm0, %v1401_v17  ;;  %v1750_v4 = vadd.f32 %v1412_v30, %v1120_v49  ;;  %v997_v30 = vand.u32 2147483647, %v1735_v44  ;;  %v1012_v3 = vsub.s32 32, %v1011_v50 }
  0xb6   : > { %1508 = vmatprep.subr.bf16.mxu1 %v1507_v8 }
  0xb7   : > { %v1230_v20 = vand.u32 2139095040, %v1750_v4  ;;  %v1004_v41 = vand.u32 8388607, %v997_v30  ;;  %v1015_v12 = vshrl.u32 %v1601_v63, %v1012_v3  ;;  %v1018_v15 = vshrl.u32 %v1602_v6, %v1012_v3 }
  0xb8   : > { %1490 = vmatmul.mubr.msk.f32.vlgmr.msra.gmra.mrb[0].mxu0 %vm266_vm0, %v1402_v21  ;;  %v1836_v14 = vshrl.u32 %v1600_v61, %v1012_v3  ;;  %v1024_v23 = vshrl.u32 %v1598_v54, %v1012_v3 }
  0xb9   : > { %1496 = vmatprep.mubr.msk.f32.mxu0 %vm266_vm0, %v1401_v17  ;;  %1522 = vmatpush3.bf16.msra.mxu0 %v1687_v52  ;;  %v1597_v52 = vmov 2102212464   ;;  %v912_v17 = vor.u32 %v911_v5, %v910_v62  ;;  %v1231_v28 = vshrl.u32 %v1230_v20, 23  ;;  %v1005_v57 = vor.u32 8388608, %v1004_v41 }
  0xba   : > { %v919_v53 = vshll.u32 %v1597_v52, %v907_v42  ;;  %v917_v10 = vshrl.u32 %v1597_v52, %v908_v47  ;;  %v1021_v20 = vshrl.u32 %v1597_v52, %v1012_v3 }
  0xbb   : > { %v933_v0 = vsel %vm925_vm7, %v912_v17, %v915_v18  ;;  %v1425_v37 = vadd.s32 4294967169, %v1231_v28  ;;  %v929_v48 = vsel %vm925_vm7, %v909_v33, %v912_v17  ;;  %v1027_v33 = vshrl.u32 %v1599_v58, %v1012_v3 }
  0xbc   : > { %1469 = vmatmul.mubr.msk.f32.vlgmr.msra.gmra.mrb[0].mxu1 %vm266_vm0, %v1402_v21  ;;  %v921_v11 = vor.u32 %v920_v55, %v919_v53  ;;  %v1227_v53 = vand.u32 2147483647, %v1750_v4 }
  0xbd   : > { %1510 = vmatpush3.bf16.msra.mxu1 %v1507_v8  ;;  %1475 = vmatprep.mubr.f32.mxu1 %v341_v19  ;;  %v916_v8 = vshll.u32 %v1602_v6, %v907_v42  ;;  %v1237_v55 = vadd.s32 1, %v1425_v37 }
  0xbe   : > { %v934_v22 = vsel %vm928_vm6, %v921_v11, 920167782  ;;  %v1808_v5 = vand.u32 8388607, %v1227_v53 }
  0xbf   : > { %v918_v19 = vor.u32 %v917_v10, %v916_v8  ;;  %vm1238_vm12 = vcmp.gt.s32.totalorder %v1237_v55, 0  ;;  %v1813_v10 = vshll.u32 %v1005_v57, 8 }
  0xc0   : > { %1497 = vmatmul.mubr.msk.f32.vlgmr.msra.gmra.mrb[0].mxu0 %vm266_vm0, %v1402_v21  ;;  %v1421_v21 = vadd.s32 4294967169, %v1127_v9  ;;  %v1817_v9 = vand.u32 8388607, %v1123_v59  ;;  %v1239_v17 = vsel %vm1238_vm12, %v1237_v55, 0 }
  0xc1   : > { %v935_v24 = vsel %vm927_vm8, %v918_v19, %v934_v22  ;;  %v937_v26 = vsel %vm925_vm7, %v915_v18, %v918_v19  ;;  %v930_v35 = vsel %vm928_vm6, %v918_v19, 2102212464  ;;  %v1020_v19 = vshll.u32 %v1602_v6, %v1011_v50 }
  0xc2   : > { %v1133_v25 = vadd.s32 1, %v1421_v21  ;;  %v936_v32 = vsel %vm926_vm9, %v933_v0, %v935_v24  ;;  %v931_v49 = vsel %vm927_vm8, %v915_v18, %v930_v35  ;;  %v1827_v18 = vshrl.u32 %v1009_v36, 5 }
  0xc3   : > { %v1786_v39 = vmul.u32.u64.low %v1775_v29, %v936_v32  ;;  %v1787_v40 = vmul.u32.u64.high %v1775_v29, %v936_v32, %v1786_v39  ;;  %v1804_v62 = vsel %vm926_vm9, %v929_v48, %v931_v49  ;;  %v1235_v21 = vor.u32 8388608, %v1808_v5 }
  0xc4   : > { %1476 = vmatmul.mubr.f32.vlgmr.msra.gmra.mrb[0].mxu1 %v351_v1  ;;  %v938_v1 = vsel %vm928_vm6, %v924_v13, 1326507024  ;;  %vm1134_vm11 = vcmp.gt.s32.totalorder %v1133_v25, 0  ;;  %v948_v7 = vmul.u32 %v1775_v29, %v1804_v62  ;;  %v1017_v13 = vshll.u32 %v1601_v63, %v1011_v50 }
  0xc5   : > { %v939_v27 = vsel %vm927_vm8, %v921_v11, %v938_v1  ;;  %v1135_v47 = vsel %vm1134_vm11, %v1133_v25, 0  ;;  %v951_v8 = vadd.s32 1, %v1787_v40  ;;  %v1014_v11 = vshll.u32 %v1600_v61, %v1011_v50 }
  0xc6   : > { %v940_v34 = vsel %vm926_vm9, %v937_v26, %v939_v27  ;;  %v1137_v60 = vand.u32 31, %v1135_v47  ;;  %v1023_v1 = vshll.u32 %v1597_v52, %v1011_v50  ;;  %v1131_v0 = vor.u32 8388608, %v1817_v9 }
  0xc7   : > { %v1793_v42 = vmul.u32.u64.low %v1775_v29, %v940_v34  ;;  %v1794_v45 = vmul.u32.u64.high %v1775_v29, %v940_v34, %v1793_v42  ;;  %v1241_v26 = vand.u32 31, %v1239_v17  ;;  %v1845_v27 = vor.u32 %v1015_v12, %v1014_v11 }
  0xc8   : > { %v1819_v56 = vsub.s32 32, %v1137_v60  ;;  %v1847_v28 = vor.u32 %v1018_v15, %v1017_v13  ;;  %v1026_v32 = vshll.u32 %v1598_v54, %v1011_v50  ;;  %v1851_v34 = vshrl.u32 %v1135_v47, 5 }
  0xc9   : > { %vm950_vm13 = vc.u32 %v1794_v45, %v1786_v39  ;;  %v1149_v35 = vshll.u32 %v1597_v52, %v1137_v60  ;;  %v1152_v36 = vshll.u32 %v1598_v54, %v1137_v60  ;;  %v1855_v37 = vor.u32 %v1021_v20, %v1020_v19 }
  0xca   : > { %v1833_v22 = vsel %vm950_vm13, %v951_v8, %v1787_v40  ;;  %v1150_v24 = vshrl.u32 %v1598_v54, %v1819_v56  ;;  %v1153_v25 = vshrl.u32 %v1599_v58, %v1819_v56  ;;  %v1141_v40 = vshrl.u32 %v1601_v63, %v1819_v56 }
  0xcb   : > { %v1144_v41 = vshrl.u32 %v1602_v6, %v1819_v56  ;;  %v1147_v42 = vshrl.u32 %v1597_v52, %v1819_v56  ;;  %v1025_v48 = vor.u32 %v1024_v23, %v1023_v1  ;;  %vm1032_vm14 = vcmp.lt.s32.totalorder %v1827_v18, 4 }
  0xcc   : > { %v1151_v49 = vor.u32 %v1150_v24, %v1149_v35  ;;  %v1154_v50 = vor.u32 %v1153_v25, %v1152_v36  ;;  %v1864_v47 = vsub.s32 32, %v1241_v26  ;;  %v1140_v55 = vshll.u32 %v1600_v61, %v1137_v60 }
  0xcd   : > { %v1143_v57 = vshll.u32 %v1601_v63, %v1137_v60  ;;  %v1146_v3 = vshll.u32 %v1602_v6, %v1137_v60  ;;  %v1028_v8 = vor.u32 %v1027_v33, %v1026_v32  ;;  %vm1158_vm15 = vcmp.lt.s32.totalorder %v1851_v34, 4 }
  0xce   : > { %vm1029_vm0 = vcmp.lt.s32.totalorder %v1827_v18, 1  ;;  %vm1030_vm1 = vcmp.lt.s32.totalorder %v1827_v18, 2  ;;  %vm1031_vm3 = vcmp.lt.s32.totalorder %v1827_v18, 3  ;;  %v1873_v11 = vor.u32 %v1141_v40, %v1140_v55 }
  0xcf   : > { %v1875_v12 = vor.u32 %v1144_v41, %v1143_v57  ;;  %v1148_v13 = vor.u32 %v1147_v42, %v1146_v3  ;;  %v1038_v15 = vsel %vm1032_vm14, %v1025_v48, 920167782  ;;  %v1164_v60 = vsel %vm1158_vm15, %v1151_v49, 920167782 }
  0xd0   : > { %v1168_v19 = vsel %vm1158_vm15, %v1154_v50, 1326507024  ;;  %v1253_v20 = vshll.u32 %v1597_v52, %v1241_v26  ;;  %v1254_v1 = vshrl.u32 %v1598_v54, %v1864_v47  ;;  %v1042_v23 = vsel %vm1032_vm14, %v1028_v8, 1326507024 }
  0xd1   : > { %v1888_v24 = vshrl.u32 %v1239_v17, 5  ;;  %v1256_v25 = vshll.u32 %v1598_v54, %v1241_v26  ;;  %v1257_v32 = vshrl.u32 %v1599_v58, %v1864_v47  ;;  %v1037_v33 = vsel %vm1029_vm0, %v1845_v27, %v1847_v28 }
  0xd2   : > { %v1039_v35 = vsel %vm1031_vm3, %v1855_v37, %v1038_v15  ;;  %v1244_v36 = vshll.u32 %v1600_v61, %v1241_v26  ;;  %v1245_v17 = vshrl.u32 %v1601_v63, %v1864_v47  ;;  %v1247_v40 = vshll.u32 %v1601_v63, %v1241_v26 }
  0xd3   : > { %v1248_v54 = vshrl.u32 %v1602_v6, %v1864_v47  ;;  %v1250_v58 = vshll.u32 %v1602_v6, %v1241_v26  ;;  %v1251_v41 = vshrl.u32 %v1597_v52, %v1864_v47  ;;  %vm1155_vm4 = vcmp.lt.s32.totalorder %v1851_v34, 1 }
  0xd4   : > { %v1041_v42 = vsel %vm1029_vm0, %v1847_v28, %v1855_v37  ;;  %v1043_v50 = vsel %vm1031_vm3, %v1025_v48, %v1042_v23  ;;  %v1255_v55 = vor.u32 %v1254_v1, %v1253_v20  ;;  %vm1157_vm6 = vcmp.lt.s32.totalorder %v1851_v34, 3 }
  0xd5   : > { %v1163_v63 = vsel %vm1155_vm4, %v1873_v11, %v1875_v12  ;;  %v1258_v6 = vor.u32 %v1257_v32, %v1256_v25  ;;  %vm1262_vm7 = vcmp.lt.s32.totalorder %v1888_v24, 4  ;;  %v1165_v52 = vsel %vm1157_vm6, %v1148_v13, %v1164_v60 }
  0xd6   : > { %v1167_v26 = vsel %vm1155_vm4, %v1875_v12, %v1148_v13  ;;  %v1169_v48 = vsel %vm1157_vm6, %v1151_v49, %v1168_v19  ;;  %v1040_v57 = vsel %vm1030_vm1, %v1037_v33, %v1039_v35  ;;  %v1044_v3 = vsel %vm1030_vm1, %v1041_v42, %v1043_v50 }
  0xd7   : > { %v1246_v8 = vor.u32 %v1245_v17, %v1244_v36  ;;  %v1249_v15 = vor.u32 %v1248_v54, %v1247_v40  ;;  %v1252_v20 = vor.u32 %v1251_v41, %v1250_v58  ;;  %vm1156_vm8 = vcmp.lt.s32.totalorder %v1851_v34, 2 }
  0xd8   : > { %vm1259_vm9 = vcmp.lt.s32.totalorder %v1888_v24, 1  ;;  %vm1261_vm10 = vcmp.lt.s32.totalorder %v1888_v24, 3  ;;  %v1268_v60 = vsel %vm1262_vm7, %v1255_v55, 920167782  ;;  %v1166_v49 = vsel %vm1156_vm8, %v1163_v63, %v1165_v52 }
  0xd9   : > { %v1941_v19 = vmul.u32.u64.low %v1813_v10, %v1040_v57  ;;  %v1942_v1 = vmul.u32.u64.high %v1813_v10, %v1040_v57, %v1941_v19  ;;  %v1272_v23 = vsel %vm1262_vm7, %v1258_v6, 1326507024  ;;  %v1170_v25 = vsel %vm1156_vm8, %v1167_v26, %v1169_v48 }
  0xda   : > { %v1171_v32 = vshll.u32 %v1131_v0, 8  ;;  %v1952_v33 = vmul.u32.u64.low %v1813_v10, %v1044_v3  ;;  %v1953_v35 = vmul.u32.u64.high %v1813_v10, %v1044_v3, %v1952_v33  ;;  %v1034_v36 = vsel %vm1032_vm14, %v1855_v37, 2102212464 }
  0xdb   : > { %vm1260_vm11 = vcmp.lt.s32.totalorder %v1888_v24, 2  ;;  %v1267_v17 = vsel %vm1259_vm9, %v1246_v8, %v1249_v15  ;;  %v1269_v40 = vsel %vm1261_vm10, %v1252_v20, %v1268_v60  ;;  %v1271_v9 = vsel %vm1259_vm9, %v1249_v15, %v1252_v20 }
  0xdc   : > { %v1963_v54 = vmul.u32.u64.low %v1171_v32, %v1166_v49  ;;  %v1964_v58 = vmul.u32.u64.high %v1171_v32, %v1166_v49, %v1963_v54  ;;  %v1273_v0 = vsel %vm1261_vm10, %v1255_v55, %v1272_v23  ;;  %v1275_v42 = vshll.u32 %v1235_v21, 8 }
  0xdd   : > { %v1971_v41 = vmul.u32.u64.low %v1171_v32, %v1170_v25  ;;  %v1972_v37 = vmul.u32.u64.high %v1171_v32, %v1170_v25, %v1971_v41  ;;  %v1033_v50 = vsel %vm1029_vm0, %v1836_v14, %v1845_v27  ;;  %v1035_v63 = vsel %vm1031_vm3, %v1847_v28, %v1034_v36 }
  0xde   : > { %v1270_v6 = vsel %vm1260_vm11, %v1267_v17, %v1269_v40  ;;  %v953_v55 = vadd.s32 %v1833_v22, %v948_v7  ;;  %v1274_v5 = vsel %vm1260_vm11, %v1271_v9, %v1273_v0  ;;  %v1139_v21 = vshrl.u32 %v1600_v61, %v1819_v56 }
  0xdf   : > { %v1160_v14 = vsel %vm1158_vm15, %v1148_v13, 2102212464  ;;  %v1036_v27 = vsel %vm1030_vm1, %v1033_v50, %v1035_v63  ;;  %v1055_v28 = vadd.s32 1, %v1942_v1  ;;  %vm1054_vm12 = vc.u32 %v1953_v35, %v1941_v19 }
  0xe0   : > { %v1998_v52 = vmul.u32.u64.low %v1275_v42, %v1270_v6  ;;  %v1999_v26 = vmul.u32.u64.high %v1275_v42, %v1270_v6, %v1998_v52  ;;  %v1243_v29 = vshrl.u32 %v1600_v61, %v1864_v47  ;;  %v1159_v56 = vsel %vm1155_vm4, %v1139_v21, %v1873_v11 }
  0xe1   : > { %v2006_v62 = vmul.u32.u64.low %v1275_v42, %v1274_v5  ;;  %v2007_v7 = vmul.u32.u64.high %v1275_v42, %v1274_v5, %v2006_v62  ;;  %v1161_v18 = vsel %vm1157_vm6, %v1875_v12, %v1160_v14  ;;  %v954_v22 = vadd.s32 536870912, %v953_v55 }
  0xe2   : > { %v1264_v13 = vsel %vm1262_vm7, %v1252_v20, 2102212464  ;;  %v1181_v48 = vadd.s32 1, %v1964_v58  ;;  %v1052_v57 = vmul.u32 %v1813_v10, %v1036_v27  ;;  %vm1180_vm13 = vc.u32 %v1972_v37, %v1963_v54 }
  0xe3   : > { %v1056_v61 = vsel %vm1054_vm12, %v1055_v28, %v1942_v1  ;;  %v1162_v47 = vsel %vm1156_vm8, %v1159_v56, %v1161_v18  ;;  %v1263_v11 = vsel %vm1259_vm9, %v1243_v29, %v1246_v8  ;;  %v1265_v12 = vsel %vm1261_vm10, %v1249_v15, %v1264_v13 }
  0xe4   : > { %v2028_v3 = vshrl.u32 %v954_v22, 30  ;;  %v1182_v20 = vsel %vm1180_vm13, %v1181_v48, %v1964_v58  ;;  %v1057_v60 = vadd.s32 %v1056_v61, %v1052_v57  ;;  %v1178_v10 = vmul.u32 %v1171_v32, %v1162_v47 }
  0xe5   : > { %v1266_v49 = vsel %vm1260_vm11, %v1263_v11, %v1265_v12  ;;  %v1285_v1 = vadd.s32 1, %v1999_v26  ;;  %vm1284_vm14 = vc.u32 %v2007_v7, %v1998_v52  ;;  %v949_v61 = vadd.s32 %v1786_v39, %v1794_v45 }
  0xe6   : > { %v1183_v34 = vadd.s32 %v1182_v20, %v1178_v10  ;;  %v956_v8 = vshll.u32 %v2028_v3, 30  ;;  %v1058_v23 = vadd.s32 536870912, %v1057_v60  ;;  %v1282_v25 = vmul.u32 %v1275_v42, %v1266_v49 }
  0xe7   : > { %v1286_v15 = vsel %vm1284_vm14, %v1285_v1, %v1999_v26  ;;  %vm895_vm4 = vcmp.lt.s32.totalorder %v1732_v31, 0  ;;  %vm2068_vm6 = vcmp.le.f32.partialorder %v893_v51, 0.7853982  ;;  %vm999_vm7 = vcmp.lt.s32.totalorder %v1735_v44, 0 }
  0xe8   : > { %v1184_v33 = vadd.s32 536870912, %v1183_v34  ;;  %v957_v36 = vsub.s32 %v953_v55, %v956_v8  ;;  %v2038_v17 = vshrl.u32 %v1058_v23, 30  ;;  %v1287_v32 = vadd.s32 %v1286_v15, %v1282_v25 }
  0xe9   : > { %vm2088_vm8 = vcmp.le.f32.partialorder %v997_v30, 0.7853982  ;;  %vm1125_vm9 = vcmp.lt.s32.totalorder %v1737_v46, 0  ;;  %vm2108_vm10 = vcmp.le.f32.partialorder %v1123_v59, 0.7853982  ;;  %vm1229_vm11 = vcmp.lt.s32.totalorder %v1750_v4, 0 }
  0xea   : > { %v2040_v40 = vshrl.u32 %v1184_v33, 30  ;;  %v959_v24 = vsub.s32 0, %v957_v36  ;;  %v1060_v58 = vshll.u32 %v2038_v17, 30  ;;  %v1288_v9 = vadd.s32 536870912, %v1287_v32 }
  0xeb   : > { %v1053_v33 = vadd.s32 %v1941_v19, %v1953_v35  ;;  %v1283_v19 = vadd.s32 %v1998_v52, %v2007_v7  ;;  %vm2124_vm12 = vcmp.le.f32.partialorder %v1227_v53, 0.7853982 }
  0xec   : > { %v1186_v0 = vshll.u32 %v2040_v40, 30  ;;  %v1414_v41 = vmin.u32 %v959_v24, %v957_v36  ;;  %v1061_v50 = vsub.s32 %v1057_v60, %v1060_v58  ;;  %v2044_v63 = vshrl.u32 %v1288_v9, 30 }
  0xee   : > { %v2046_v42 = vsub.s32 %v1183_v34, %v1186_v0  ;;  %v961_v6 = vclz %v1414_v41  ;;  %v1063_v5 = vsub.s32 0, %v1061_v50  ;;  %v1290_v55 = vshll.u32 %v2044_v63, 30 }
  0xf0   : > { %v1189_v21 = vsub.s32 0, %v2046_v42  ;;  %v1415_v14 = vadd.s32 4294967294, %v961_v6  ;;  %v1418_v27 = vmin.u32 %v1063_v5, %v1061_v50  ;;  %v2050_v28 = vsub.s32 %v1287_v32, %v1290_v55 }
  0xf1   : > { %v1179_v55 = vadd.s32 %v1963_v54, %v1972_v37 }
  0xf2   : > { %v1422_v26 = vmin.u32 %v1189_v21, %v2046_v42  ;;  %vm1416_vm15 = vcmp.lt.s32.totalorder %v1415_v14, 0  ;;  %v1065_v29 = vclz %v1418_v27  ;;  %v1293_v62 = vsub.s32 0, %v2050_v28 }
  0xf3   : > { %v964_v56 = vsel %vm1416_vm15, 0, %v1415_v14 }
  0xf4   : > { %v1191_v18 = vclz %v1422_v26  ;;  %v1419_v22 = vadd.s32 4294967294, %v1065_v29  ;;  %v1426_v13 = vmin.u32 %v1293_v62, %v2050_v28  ;;  %v969_v48 = vsub.s32 4294967266, %v964_v56 }
  0xf5   : > { %v965_v47 = vsub.s32 32, %v964_v56  ;;  %v966_v60 = vshll.u32 %v957_v36, %v964_v56 }
  0xf6   : > { %v1423_v57 = vadd.s32 4294967294, %v1191_v18  ;;  %vm1420_vm0 = vcmp.lt.s32.totalorder %v1419_v22, 0  ;;  %v1295_v11 = vclz %v1426_v13  ;;  %v970_v12 = vadd.s32 127, %v969_v48 }
  0xf7   : > { %v1068_v20 = vsel %vm1420_vm0, 0, %v1419_v22  ;;  %v967_v10 = vshrl.u32 %v949_v61, %v965_v47 }
  0xf8   : > { %vm1424_vm1 = vcmp.lt.s32.totalorder %v1423_v57, 0  ;;  %v1427_v49 = vadd.s32 4294967294, %v1295_v11  ;;  %v971_v1 = vshll.u32 %v970_v12, 23  ;;  %v1073_v8 = vsub.s32 4294967266, %v1068_v20 }
  0xf9   : > { %v1194_v34 = vsel %vm1424_vm1, 0, %v1423_v57  ;;  %v968_v23 = vor.u32 %v967_v10, %v966_v60  ;;  %v1069_v39 = vsub.s32 32, %v1068_v20  ;;  %v1070_v0 = vshll.u32 %v1061_v50, %v1068_v20  ;;  %v2078_v10 = vpop.permute.xlu0 %780 }
  0xfa   : > { %vm1428_vm3 = vcmp.lt.s32.totalorder %v1427_v49, 0  ;;  %v1199_v25 = vsub.s32 4294967266, %v1194_v34  ;;  %v972_v15 = vor.u32 4788187, %v971_v1  ;;  %v1074_v45 = vadd.s32 127, %v1073_v8 }
  0xfb   : > { %v1298_v32 = vsel %vm1428_vm3, 0, %v1427_v49  ;;  %v975_v24 = vcvt.s32.f32 %v968_v23  ;;  %v1071_v36 = vshrl.u32 %v1053_v33, %v1069_v39  ;;  %v1195_v5 = vsub.s32 32, %v1194_v34 }
  0xfc   : > { %v1200_v58 = vadd.s32 127, %v1199_v25  ;;  %v973_v9 = vand.u32 2147483647, %v972_v15  ;;  %v1075_v41 = vshll.u32 %v1074_v45, 23  ;;  %v1303_v6 = vsub.s32 4294967266, %v1298_v32 }
  0xfd   : > { %v1072_v27 = vor.u32 %v1071_v36, %v1070_v0  ;;  %v1299_v35 = vsub.s32 32, %v1298_v32  ;;  %v1197_v62 = vshrl.u32 %v1179_v55, %v1195_v5  ;;  %v1196_v50 = vshll.u32 %v2046_v42, %v1194_v34  ;;  %v2081_v34 = vpop.permute.xlu1 %783  ;;  %v2095_v45 = vpop.permute.xlu0 %798 }
  0xfe   : > { %v1201_v21 = vshll.u32 %v1200_v58, 23  ;;  %v976_v14 = vmul.f32 %v975_v24, %v973_v9  ;;  %v1076_v26 = vor.u32 4788187, %v1075_v41  ;;  %v1304_v29 = vadd.s32 127, %v1303_v6 }
  0xff   : > { %v1079_v22 = vcvt.s32.f32 %v1072_v27  ;;  %v1300_v54 = vshll.u32 %v2050_v28, %v1298_v32  ;;  %v1301_v37 = vshrl.u32 %v1283_v19, %v1299_v35  ;;  %v1198_v57 = vor.u32 %v1197_v62, %v1196_v50 }
 0x100   : > { %v1202_v56 = vor.u32 4788187, %v1201_v21  ;;  %v977_v18 = vxor.u32 2147483648, %v976_v14  ;;  %v1077_v13 = vand.u32 2147483647, %v1076_v26  ;;  %v1305_v48 = vshll.u32 %v1304_v29, 23 }
 0x101   : > { %v1302_v47 = vor.u32 %v1301_v37, %v1300_v54  ;;  %v1205_v12 = vcvt.s32.f32 %v1198_v57  ;;  %v979_v20 = vsub.s32 4, %v2028_v3  ;;  %v1209_v39 = vsub.s32 4, %v2040_v40  ;;  %v2104_v9 = vpop.permute.xlu1 %801  ;;  %v2120_v55 = vpop.permute.xlu0 %816 }
 0x102   : > { %v978_v7 = vsel %vm895_vm4, %v977_v18, %v976_v14  ;;  %v1203_v61 = vand.u32 2147483647, %v1202_v56  ;;  %v1080_v42 = vmul.f32 %v1079_v22, %v1077_v13  ;;  %v1306_v11 = vor.u32 4788187, %v1305_v48 }
 0x103   : > { %v981_v28 = vsel %vm2068_vm6, %v1732_v31, %v978_v7  ;;  %v1309_v1 = vcvt.s32.f32 %v1302_v47  ;;  %v980_v8 = vsel %vm895_vm4, %v979_v20, %v2028_v3  ;;  %v1083_v32 = vsub.s32 4, %v2038_v17 }
 0x104   : > { %v1206_v60 = vmul.f32 %v1205_v12, %v1203_v61  ;;  %v1081_v51 = vxor.u32 2147483648, %v1080_v42  ;;  %v1307_v49 = vand.u32 2147483647, %v1306_v11  ;;  %1571 = vcosq.f32 %v981_v28 }
 0x105   : > { %1573 = vsinq.f32 %v981_v28  ;;  %v982_v30 = vsel %vm2068_vm6, 0, %v980_v8  ;;  %v1210_v36 = vsel %vm1125_vm9, %v1209_v39, %v2040_v40  ;;  %v1084_v6 = vsel %vm999_vm7, %v1083_v32, %v2038_v17  ;;  %v2135_v35 = vpop.permute.xlu1 %819  ;;  %v2143_v22 = vpop.permute.xlu0 %834 }
 0x106   : > { %v1207_v25 = vxor.u32 2147483648, %v1206_v60  ;;  %v1082_v15 = vsel %vm999_vm7, %v1081_v51, %v1080_v42  ;;  %v1310_v33 = vmul.f32 %v1309_v1, %v1307_v49  ;;  %v986_v41 = vadd.s32 3, %v982_v30 }
 0x107   : > { %v1085_v3 = vsel %vm2088_vm8, %v1735_v44, %v1082_v15  ;;  %v1212_v17 = vsel %vm2108_vm10, 0, %v1210_v36  ;;  %v1086_v14 = vsel %vm2088_vm8, 0, %v1084_v6  ;;  %v1313_v27 = vsub.s32 4, %v2044_v63 }
 0x108   : > { %v1208_v24 = vsel %vm1125_vm9, %v1207_v25, %v1206_v60  ;;  %v1311_v58 = vxor.u32 2147483648, %v1310_v33  ;;  %1575 = vcosq.f32 %v1085_v3  ;;  %v987_v19 = vand.u32 3, %v986_v41 }
 0x109   : > { %v1211_v5 = vsel %vm2108_vm10, %v1737_v46, %v1208_v24  ;;  %1577 = vsinq.f32 %v1085_v3  ;;  %v1216_v29 = vadd.s32 3, %v1212_v17  ;;  %v1090_v62 = vadd.s32 3, %v1086_v14  ;;  %v2147_v37 = vpop.permute.xlu1 %837  ;;  %v2164_v28 = vpop.permute.xlu0 %852 }
 0x10a   : > { %v1312_v40 = vsel %vm1229_vm11, %v1311_v58, %v1310_v33  ;;  %1579 = vcosq.f32 %v1211_v5  ;;  %v1314_v18 = vsel %vm1229_vm11, %v1313_v27, %v2044_v63  ;;  %vm989_vm13 = vcmp.eq.s32.totalorder %v987_v19, 0 }
 0x10b   : > { %v1315_v53 = vsel %vm2124_vm12, %v1750_v4, %v1312_v40  ;;  %1581 = vsinq.f32 %v1211_v5  ;;  %vm992_vm14 = vcmp.eq.s32.totalorder %v987_v19, 2  ;;  %vm988_vm15 = vcmp.lt.s32.totalorder %v987_v19, 2 }
 0x10c   : > { %1583 = vcosq.f32 %v1315_v53  ;;  %v1316_v54 = vsel %vm2124_vm12, 0, %v1314_v18  ;;  %v2149_v57 = vand.u32 3, %v1216_v29  ;;  %v1091_v61 = vand.u32 3, %v1090_v62 }
 0x10d   : > { %1585 = vsinq.f32 %v1315_v53  ;;  %v2154_v63 = vsel %vm1665_vm2, 1.0, %v1596_v16  ;;  %v2159_v47 = vsel %vm1673_vm5, 1.0, %v1596_v16  ;;  %vm785_vm0 = vcmp.eq.s32.totalorder %v2078_v10, 1  ;;  %v856_v43 = vpop.permute.xlu1 %855 }
 0x10e   : > { %v1572_v21 = vpop.eup %1571  ;;  %vm985_vm1 = vweird.f32 %v1732_v31  ;;  %v1320_v11 = vadd.s32 3, %v1316_v54  ;;  %vm803_vm3 = vcmp.eq.s32.totalorder %v2095_v45, 1  ;;  %vm1089_vm2 = vweird.f32 %v1735_v44 }
 0x10f   : > { %v1574_v26 = vpop.eup %1573  ;;  %v993_v56 = vxor.u32 2147483648, %v1572_v21  ;;  %vm786_vm5 = vcmp.eq.s32.totalorder %v2081_v34, 1  ;;  %vm1219_vm4 = vcmp.eq.s32.totalorder %v2149_v57, 0  ;;  %vm821_vm6 = vcmp.eq.s32.totalorder %v2120_v55, 1 }
 0x110   : > { %v990_v50 = vxor.u32 2147483648, %v1574_v26  ;;  %vm1093_vm7 = vcmp.eq.s32.totalorder %v1091_v61, 0  ;;  %vm1096_vm8 = vcmp.eq.s32.totalorder %v1091_v61, 2  ;;  %vm804_vm9 = vcmp.eq.s32.totalorder %v2104_v9, 1 }
 0x111   : > { %v994_v7 = vsel %vm992_vm14, %v993_v56, %v1574_v26  ;;  %vm1222_vm10 = vcmp.eq.s32.totalorder %v2149_v57, 2  ;;  %vm839_vm11 = vcmp.eq.s32.totalorder %v2143_v22, 1  ;;  %vm1092_vm12 = vcmp.lt.s32.totalorder %v1091_v61, 2 }
 0x112   : > { %v1576_v13 = vpop.eup %1575  ;;  %v991_v52 = vsel %vm989_vm13, %v1572_v21, %v990_v50  ;;  %v789_v49 = vsub.s32 0, %v1636_v2  ;;  %v807_v1 = vsub.s32 1, %v1636_v2  ;;  %v1321_v15 = vand.u32 3, %v1320_v11 }
 0x113   : > { %v1578_v48 = vpop.eup %1577  ;;  %v995_v38 = vsel %vm988_vm15, %v991_v52, %v994_v7  ;;  %v1097_v51 = vxor.u32 2147483648, %v1576_v13  ;;  %v825_v58 = vsub.s32 3, %v1636_v2  ;;  %vm822_vm14 = vcmp.eq.s32.totalorder %v2135_v35, 1 }
 0x114   : > { %v1580_v20 = vpop.eup %1579  ;;  %v1094_v60 = vxor.u32 2147483648, %v1578_v48  ;;  %v996_v25 = vsel %vm985_vm1, nan, %v995_v38  ;;  %vm840_vm15 = vcmp.eq.s32.totalorder %v2147_v37, 1  ;;  %vm858_vm13 = vcmp.eq.s32.totalorder %v856_v43, 1 }
 0x115   : > { %v1582_v8 = vpop.eup %1581  ;;  %v1223_v23 = vxor.u32 2147483648, %v1580_v20  ;;  %v1098_v3 = vsel %vm1096_vm8, %v1097_v51, %v1578_v48  ;;  %v843_v31 = vsub.s32 5, %v1636_v2  ;;  %v861_v5 = vsub.s32 7, %v1636_v2 }
 0x116   : > { %v1584_v32 = vpop.eup %1583  ;;  %v1095_v30 = vsel %vm1093_vm7, %v1576_v13, %v1094_v60  ;;  %v1220_v36 = vxor.u32 2147483648, %v1582_v8  ;;  %vm1323_vm1 = vcmp.eq.s32.totalorder %v1321_v15, 0  ;;  %vm1326_vm7 = vcmp.eq.s32.totalorder %v1321_v15, 2 }
 0x117   : > { %v1586_v0 = vpop.eup %1585  ;;  %v1224_v59 = vsel %vm1222_vm10, %v1223_v23, %v1582_v8  ;;  %v1099_v40 = vsel %vm1092_vm12, %v1095_v30, %v1098_v3  ;;  %v1327_v21 = vxor.u32 2147483648, %v1584_v32 }
 0x118   : > { %v1324_v17 = vxor.u32 2147483648, %v1586_v0  ;;  %v1221_v29 = vsel %vm1219_vm4, %v1580_v20, %v1220_v36  ;;  %v1100_v50 = vsel %vm1089_vm2, nan, %v1099_v40  ;;  %vm1319_vm2 = vweird.f32 %v1750_v4 }
 0x119   : > { %v1328_v18 = vsel %vm1326_vm7, %v1327_v21, %v1586_v0  ;;  %vm1215_vm4 = vweird.f32 %v1737_v46 }
 0x11a   : > { %v1325_v56 = vsel %vm1323_vm1, %v1584_v32, %v1324_v17 }
 0x193   : > { %v1498_v42 = vpop.f32.mrb[0].mxu0 }
 0x194   : > { %v765_v12 = vpop.f32.mrb[1].mxu0 }
 0x197   : > { %v1477_v16 = vpop.f32.mrb[0].mxu1 }
 0x198   : > { %v1523_v33 = vadd.f32 %v1498_v42, %v1477_v16  ;;  %v519_v39 = vpop.f32.mrb[1].mxu1 }
 0x199   : > { %v1524_v24 = vadd.f32 %v765_v12, %v519_v39 }
 0x19b   : > { %v790_v41 = vrot.slane %v1524_v24, %v789_v49  ;;  %v808_v6 = vrot.slane %v1524_v24, %v807_v1  ;;  %v826_v26 = vrot.slane %v1524_v24, %v825_v58  ;;  %v844_v53 = vrot.slane %v1524_v24, %v843_v31 }
 0x19c   : > { %v862_v34 = vrot.slane %v1524_v24, %v861_v5 }
 0x19d   : > { %v791_v14 = vsel %vm785_vm0, %v790_v41, 0.0  ;;  %v792_v27 = vsel %vm786_vm5, %v790_v41, 0.0  ;;  %vm1322_vm0 = vcmp.lt.s32.totalorder %v1321_v15, 2  ;;  %vm1218_vm5 = vcmp.lt.s32.totalorder %v2149_v57, 2 }
 0x19e   : > { %v809_v19 = vsel %vm803_vm3, %v808_v6, %v791_v14  ;;  %v810_v2 = vsel %vm804_vm9, %v808_v6, %v792_v27  ;;  %vm2241_vm3 = vcmp.eq.s32.totalorder %v2164_v28, 1  ;;  %v1225_v44 = vsel %vm1218_vm5, %v1221_v29, %v1224_v59 }
 0x19f   : > { %v827_v62 = vsel %vm821_vm6, %v826_v26, %v809_v19  ;;  %v828_v10 = vsel %vm822_vm14, %v826_v26, %v810_v2  ;;  %v1329_v22 = vsel %vm1322_vm0, %v1325_v56, %v1328_v18  ;;  %v1226_v61 = vsel %vm1215_vm4, nan, %v1225_v44 }
 0x1a0   : > { %v845_v45 = vsel %vm839_vm11, %v844_v53, %v827_v62  ;;  %v846_v9 = vsel %vm840_vm15, %v844_v53, %v828_v10  ;;  %v1330_v42 = vsel %vm1319_vm2, nan, %v1329_v22 }
 0x1a1   : > { %v863_v55 = vsel %vm2241_vm3, %v862_v34, %v845_v45  ;;  %v864_v35 = vsel %vm858_vm13, %v862_v34, %v846_v9 }
 0x1a2   : > { %v1101_v13 = vadd.f32 %v996_v25, %v863_v55  ;;  %v1102_v54 = vadd.f32 %v1100_v50, %v864_v35 }
 0x1a4   : > { %v1103_v37 = vmul.f32 %v2154_v63, %v1101_v13  ;;  %v1104_v48 = vmul.f32 %v2159_v47, %v1102_v54 }
 0x1a6   : > { %v1105_v52 = vadd.f32 %v1524_v24, %v1103_v37  ;;  %v1106_v7 = vadd.f32 %v1523_v33, %v1104_v48 }
 0x1a8   : > { %v1331_v57 = vadd.f32 %v1226_v61, %v1105_v52  ;;  %v1332_v11 = vadd.f32 %v1330_v42, %v1106_v7 }
 0x1aa   : > { %1333 = vst [vmem:[%s170_s29] sm:$0xff] %v1331_v57  ;;  %1334 = vst [vmem:[%s170_s29 + $0x8] sm:$0x1] %v1332_v11 }
 0x1ab PF: > { %s13_s12 = sadd.s32 1, %s1593_s12  }
 0x1ac   : > { %p10_p4 = scmp.ge.s32.totalorder %s13_s12, 4  }
 0x1ae   :  { %12 = sbr.rel (!%p10_p4) target bundleno = 1 (0x1), region = 62 }

</bundles_post_ra>
